<compile_context>
chip_gen: v7x
topology: tpu7x:2x2x1
jax: 0.10.0
libtpu: 0.0.40
codegen_flags: <defaults>
</compile_context>

<pallas_src>
import functools

import jax
import jax.numpy as jnp
from jax.experimental import pallas as pl
from jax.experimental.pallas import tpu as pltpu


def _va_decoder_kernel(x_ref, p_ref, o_ref):
    # x_ref: (tb, T*D) flattened input block (lane-dense minor dim).
    # p_ref: (T*D + T + 1, T) packed parameters:
    #   rows 0 .. T*D-1          : W1blk  (block-diagonal Linear(d_model->1))
    #   row  T*D, col 0          : b1
    #   row  T*D, cols 1:3       : b2
    #   rows T*D+1 .. T*D+T,
    #        cols 0:2            : w2^T   (Linear(ts_steps->2) weight, transposed)
    # o_ref: (tb, 2) output block.
    nrows, T = p_ref.shape
    TD = nrows - T - 1

    x = x_ref[...].astype(jnp.float32)          # (tb, T*D), f32 math (bf16-input safe)
    p = p_ref[...]                              # (T*D + T + 1, T)

    w1blk = p[:TD, :]                           # (T*D, T) block-diagonal weight
    b1 = p[TD:TD + 1, 0:1]                      # (1, 1)
    b2 = p[TD:TD + 1, 1:3]                      # (1, 2)
    w2t = p[TD + 1:, 0:2]                       # (T, 2)

    # Linear(d_model -> 1) + squeeze(-1) as one MXU matmul (K = T*D).
    h = jnp.dot(x, w1blk, preferred_element_type=jnp.float32) + b1   # (tb, T)
    h = jnp.maximum(h, 0.0)                                          # ReLU
    # Dropout: eval-mode identity.
    # TODO(synk): training-mode dropout mask not implemented (inference semantics).

    # Linear(ts_steps -> 2).
    out = jnp.dot(h, w2t, preferred_element_type=jnp.float32) + b2   # (tb, 2)
    o_ref[...] = out.astype(o_ref.dtype)


def prepare_va_decoder_params(w1, b1, w2, b2):
    """Pack parameters ONCE at model init.

    w1: (1, D)  Linear(d_model -> 1) weight (torch layout (out, in))
    b1: (1,)    its bias
    w2: (2, T)  Linear(ts_steps -> 2) weight
    b2: (2,)    its bias
    Returns a single (T*D + T + 1, T) float32 array (see kernel docstring).
    """
    one, D = w1.shape
    two, T = w2.shape
    assert one == 1 and two == 2, (w1.shape, w2.shape)
    assert T >= 3, "b2 is packed into cols 1:3 of the bias row -> needs ts_steps >= 3"
    TD = T * D

    w1f = w1[0].astype(jnp.float32)                                   # (D,)
    # Block-diagonal weight: W1blk[t*D + d, t] = w1[d].
    w1blk = (jnp.eye(T, dtype=jnp.float32)[:, None, :]
             * w1f[None, :, None]).reshape(TD, T)                     # (T*D, T)

    bias_row = jnp.zeros((1, T), jnp.float32)
    bias_row = bias_row.at[0, 0].set(b1.reshape(()).astype(jnp.float32))
    bias_row = bias_row.at[0, 1:3].set(b2.astype(jnp.float32))

    w2t_rows = jnp.zeros((T, T), jnp.float32)
    w2t_rows = w2t_rows.at[:, 0:2].set(w2.T.astype(jnp.float32))

    return jnp.concatenate([w1blk, bias_row, w2t_rows], axis=0)       # (T*D+T+1, T)


@functools.partial(jax.jit, static_argnames=("tile_b",))
def valence_arousal_decoder_packed(x, params, *, tile_b=4096):
    """x: (B, T, D); params: output of prepare_va_decoder_params. Returns (B, 2)."""
    B, T, D = x.shape
    TD = T * D
    assert params.shape == (TD + T + 1, T), (params.shape, (TD + T + 1, T))
    assert tile_b % 8 == 0, tile_b

    x_flat = x.reshape(B, TD)   # free: x is contiguous; gives a 256-lane-dense minor dim

    if B > tile_b:
        tb = tile_b
    else:
        # Split the batch into >= 2 grid steps when possible so the "parallel"
        # grid axis shards across v7x's two TensorCores; tb must be a multiple
        # of 8 (sublane rule) unless it equals the full batch.
        half = pl.cdiv(B, 2)
        half = ((half + 7) // 8) * 8
        tb = half if half < B else B

    grid = (pl.cdiv(B, tb),)

    return pl.pallas_call(
        _va_decoder_kernel,
        out_shape=jax.ShapeDtypeStruct((B, 2), x.dtype),
        grid=grid,
        in_specs=[
            pl.BlockSpec((tb, TD), lambda i: (i, 0)),          # x, tiled over batch
            pl.BlockSpec(params.shape, lambda i: (0, 0)),      # packed params (resident)
        ],
        out_specs=pl.BlockSpec((tb, 2), lambda i: (i, 0)),
        compiler_params=pltpu.CompilerParams(
            dimension_semantics=("parallel",)),
    )(x_flat, params)


def valence_arousal_decoder(x, w1, b1, w2, b2, *, tile_b=4096):
    """Convenience wrapper; prefer calling prepare_va_decoder_params once at init."""
    params = prepare_va_decoder_params(w1, b1, w2, b2)
    return valence_arousal_decoder_packed(x, params, tile_b=tile_b)


def _reference(x, w1, b1, w2, b2):
    h = jnp.einsum("btd,od->bto", x, w1, precision="highest") + b1    # (B, T, 1)
    h = jnp.maximum(h[..., 0], 0.0)                                   # (B, T)
    return jnp.einsum("bt,ot->bo", h, w2, precision="highest") + b2   # (B, 2)


if __name__ == "__main__":
    key = jax.random.PRNGKey(0)
    kx, kw1, kb1, kw2, kb2 = jax.random.split(key, 5)

    def run_case(B, T, D, tile_b=4096):
        x = jax.random.normal(jax.random.fold_in(kx, B), (B, T, D), dtype=jnp.float32)
        # Deterministic synthetic parameters (torch Linear layouts: (out, in) weights).
        w1 = jax.random.normal(kw1, (1, D), dtype=jnp.float32) * 0.1
        b1 = jax.random.normal(kb1, (1,), dtype=jnp.float32) * 0.1
        w2 = jax.random.normal(kw2, (2, T), dtype=jnp.float32) * 0.1
        b2 = jax.random.normal(kb2, (2,), dtype=jnp.float32) * 0.1

        params = prepare_va_decoder_params(w1, b1, w2, b2)   # once, at "init"
        out = jax.block_until_ready(
            valence_arousal_decoder_packed(x, params, tile_b=tile_b))
        ref = _reference(x, w1, b1, w2, b2)
        assert out.shape == (B, 2), out.shape
        assert jnp.allclose(out, ref, atol=1e-4, rtol=1e-4), (out, ref)

    # Module-sized case: batch=2, ts_steps=8, d_model=32 (single block, grid=(1,)).
    run_case(B=2, T=8, D=32)
    # Batch split into 2 parallel steps with a partial last tile (v7x 2-TC path).
    run_case(B=20, T=8, D=32)
    # Multi-step pipelined path with an explicit small tile.
    run_case(B=64, T=8, D=32, tile_b=16)

    print("KERNEL_OK")
</pallas_src>

<mosaic_0001>
module attributes {stable_mosaic.version = 11 : i64} {
  func.func @_va_decoder_kernel(%arg0: i32, %arg1: memref<2x256xf32, #tpu.memory_space<vmem>>, %arg2: memref<265x8xf32, #tpu.memory_space<vmem>>, %arg3: memref<2x2xf32, #tpu.memory_space<vmem>>) attributes {dimension_semantics = [#tpu.dimension_semantics<parallel>], iteration_bounds = array<i64: 1>, scalar_prefetch = 0 : i64, scratch_operands = 0 : i64, tpu.core_type = #tpu.core_type<tc>, window_params = [{transform_indices = @transform_0, window_bounds = array<i64: 2, 256>}, {pipeline_mode = #tpu.pipeline_mode<synchronous>, transform_indices = @transform_1, window_bounds = array<i64: 265, 8>}, {transform_indices = @transform_2, window_bounds = array<i64: 2, 2>}]} {
    %c0 = arith.constant 0 : index
    %c0_0 = arith.constant 0 : index
    %0 = vector.load %arg1[%c0, %c0_0] : memref<2x256xf32, #tpu.memory_space<vmem>>, vector<2x256xf32>
    %c0_1 = arith.constant 0 : index
    %c0_2 = arith.constant 0 : index
    %1 = vector.load %arg2[%c0_1, %c0_2] : memref<265x8xf32, #tpu.memory_space<vmem>>, vector<265x8xf32>
    %2 = vector.extract_strided_slice %1 {offsets = [0, 0], sizes = [256, 8], strides = [1, 1]} : vector<265x8xf32> to vector<256x8xf32>
    %3 = vector.extract_strided_slice %1 {offsets = [256, 0], sizes = [1, 1], strides = [1, 1]} : vector<265x8xf32> to vector<1x1xf32>
    %4 = vector.extract_strided_slice %1 {offsets = [256, 1], sizes = [1, 2], strides = [1, 1]} : vector<265x8xf32> to vector<1x2xf32>
    %5 = vector.extract_strided_slice %1 {offsets = [257, 0], sizes = [8, 2], strides = [1, 1]} : vector<265x8xf32> to vector<8x2xf32>
    %cst = arith.constant dense<0.000000e+00> : vector<2x8xf32>
    %6 = tpu.matmul %0, %2, %cst {dimension_numbers = #tpu.dot_dimension_numbers<[1], [0], [0], [1], [0, 0, 1, 1], [], []>} : vector<2x256xf32>, vector<256x8xf32>, vector<2x8xf32> -> vector<2x8xf32>
    %7 = vector.broadcast %3 : vector<1x1xf32> to vector<2x8xf32>
    %8 = arith.addf %6, %7 : vector<2x8xf32>
    %cst_3 = arith.constant 0.000000e+00 : f32
    %9 = vector.broadcast %cst_3 : f32 to vector<2x8xf32>
    %10 = arith.maximumf %8, %9 : vector<2x8xf32>
    %cst_4 = arith.constant dense<0.000000e+00> : vector<2x2xf32>
    %11 = tpu.matmul %10, %5, %cst_4 {dimension_numbers = #tpu.dot_dimension_numbers<[1], [0], [0], [1], [0, 0, 1, 1], [], []>} : vector<2x8xf32>, vector<8x2xf32>, vector<2x2xf32> -> vector<2x2xf32>
    %12 = vector.broadcast %4 : vector<1x2xf32> to vector<2x2xf32>
    %13 = arith.addf %11, %12 : vector<2x2xf32>
    %c0_5 = arith.constant 0 : index
    %c0_6 = arith.constant 0 : index
    %14 = vector.load %arg3[%c0_5, %c0_6] : memref<2x2xf32, #tpu.memory_space<vmem>>, vector<2x2xf32>
    tpu.vector_store %arg3[%c0_5, %c0_6], %13 {strides = array<i32>} : memref<2x2xf32, #tpu.memory_space<vmem>>, vector<2x2xf32>,
    return
  }
  func.func @transform_0(%arg0: i32) -> (i32, i32) {
    %c0_i32 = arith.constant 0 : i32
    %c0_i32_0 = arith.constant 0 : i32
    return %arg0, %c0_i32 : i32, i32
  }
  func.func @transform_1(%arg0: i32) -> (i32, i32) {
    %c0_i32 = arith.constant 0 : i32
    %c0_i32_0 = arith.constant 0 : i32
    %c0_i32_1 = arith.constant 0 : i32
    return %c0_i32, %c0_i32_0 : i32, i32
  }
  func.func @transform_2(%arg0: i32) -> (i32, i32) {
    %c0_i32 = arith.constant 0 : i32
    %c0_i32_0 = arith.constant 0 : i32
    return %arg0, %c0_i32 : i32, i32
  }
}

</mosaic_0001>

<bundles_post_ra>
// kernel: valence_arousal_decoder_packed.1
= control target key start
LH: loop header
LB: loop body
LE: loop exit
PB: predicated region body
PF: predicated region fallthrough
CT: control target
= control target key end

     0   :  { %s479_s0 = inlined_call_operand.vmem [shape: f32[2,256], index: 0, kind: input, shape index: {}]   ;;  %s480_s1 = inlined_call_operand.vmem [shape: f32[265,8], index: 1, kind: input, shape index: {}]   ;;  %s481_s2 = inlined_call_operand.hbm [shape: f32[2,2], index: 2, kind: output, shape index: {}]  }
   0x1   :  { %v29_v0 = vld [vmem:[%s480_s1 + $0x80] sm:$0xff]  ;;  %v30_v1 = vld [vmem:[%s480_s1 + $0x88] sm:$0xff]  ;;  %v31_v5 = vld [vmem:[%s480_s1 + $0x90] sm:$0xff] }
   0x2   :  { %v13_v2 = vld [vmem:[%s480_s1] sm:$0xff]  ;;  %v281_v3 = vpack.c.bf16 %v30_v1, %v29_v0  ;;  %v14_v4 = vld [vmem:[%s480_s1 + $0x8] sm:$0xff]  ;;  %v32_v6 = vld [vmem:[%s480_s1 + $0x98] sm:$0xff] }
   0x3   :  { %v283_v7 = vpack.c.bf16 %v14_v4, %v13_v2  ;;  %v285_v8 = vpack.c.bf16 %v32_v6, %v31_v5  ;;  %v15_v9 = vld [vmem:[%s480_s1 + $0x10] sm:$0xff]  ;;  %v16_v10 = vld [vmem:[%s480_s1 + $0x18] sm:$0xff]  ;;  %v33_v11 = vld [vmem:[%s480_s1 + $0xa0] sm:$0xff] }
   0x4   :  { %282 = vmatprep.subr.bf16.mxu0 %v281_v3  ;;  %v34_v12 = vld [vmem:[%s480_s1 + $0xa8] sm:$0xff]  ;;  %v287_v13 = vpack.c.bf16 %v16_v10, %v15_v9  ;;  %v17_v15 = vld [vmem:[%s480_s1 + $0x20] sm:$0xff]  ;;  %v35_v17 = vld [vmem:[%s480_s1 + $0xb0] sm:$0xff] }
   0x5   :  { %284 = vmatpush3.bf16.msra.mxu0 %v283_v7  ;;  %v289_v14 = vpack.c.bf16 %v34_v12, %v33_v11  ;;  %v18_v16 = vld [vmem:[%s480_s1 + $0x28] sm:$0xff]  ;;  %v36_v18 = vld [vmem:[%s480_s1 + $0xb8] sm:$0xff]  ;;  %v19_v21 = vld [vmem:[%s480_s1 + $0x30] sm:$0xff] }
   0x6   :  { %286 = vmatprep.subr.bf16.mxu0 %v285_v8  ;;  %v291_v19 = vpack.c.bf16 %v18_v16, %v17_v15  ;;  %v293_v20 = vpack.c.bf16 %v36_v18, %v35_v17  ;;  %v20_v22 = vld [vmem:[%s480_s1 + $0x38] sm:$0xff]  ;;  %v37_v23 = vld [vmem:[%s480_s1 + $0xc0] sm:$0xff]  ;;  %v38_v24 = vld [vmem:[%s480_s1 + $0xc8] sm:$0xff] }
   0x7   :  { %v237_v25 = vld.sshfl [vmem:[%s479_s0] sm:$0x33 pattern:$0x76325410] }
   0x8   :  { %v59_v26 = vcombine.high %v237_v25, %v237_v25  ;;  %v45_v27 = vld [vmem:[%s480_s1 + $0x100] sm:$0xff] }
   0x9   :  { %288 = vmatpush3.bf16.msra.mxu0 %v287_v13 }
   0xa   :  { %290 = vmatprep.subr.bf16.mxu0 %v289_v14 }
   0xb   :  { %7 = vsyncpa [#allocation3], 0  ;;  %v295_v28 = vpack.c.bf16 %v20_v22, %v19_v21  ;;  %313 = vpush %v45_v27  ;;  %v297_v29 = vpack.c.bf16 %v38_v24, %v37_v23  ;;  %v21_v30 = vld [vmem:[%s480_s1 + $0x40] sm:$0xff]  ;;  %v22_v31 = vld [vmem:[%s480_s1 + $0x48] sm:$0xff]  ;;  %126 = vmatprep.mubr.f32.mxu0 %v59_v26  ;;  %v139_v51 = vrot.slane %v45_v27, 1  ;;  %vm138_vm0 = vcmask 1046528  }
   0xc   :  { %v39_v32 = vld [vmem:[%s480_s1 + $0xd0] sm:$0xff]  ;;  %v40_v33 = vld [vmem:[%s480_s1 + $0xd8] sm:$0xff]  ;;  %v299_v34 = vpack.c.bf16 %v22_v31, %v21_v30  ;;  %v41_v38 = vld [vmem:[%s480_s1 + $0xe0] sm:$0xff]  ;;  %v343_v54 = vmov 0.0   ;;  %vm344_vm1 = vmmov 0   ;;  %v133_v56 = vlaneseq  ;;  %s345_s22 = smov 127  }
   0xd   :  { %292 = vmatpush3.bf16.msra.mxu0 %v291_v19  ;;  %v301_v35 = vpack.c.bf16 %v40_v33, %v39_v32  ;;  %v23_v36 = vld [vmem:[%s480_s1 + $0x50] sm:$0xff]  ;;  %v24_v37 = vld [vmem:[%s480_s1 + $0x58] sm:$0xff]  ;;  %v42_v39 = vld [vmem:[%s480_s1 + $0xe8] sm:$0xff]  ;;  %276 = vmatprep.subr.mxu1 %v343_v54  ;;  %vm147_vm2 = vcmask 64512   ;;  %vm221_vm3 = vcmask 9216  }
   0xe   :  { %294 = vmatprep.subr.bf16.mxu0 %v293_v20  ;;  %v303_v40 = vpack.c.bf16 %v24_v37, %v23_v36  ;;  %v305_v41 = vpack.c.bf16 %v42_v39, %v41_v38  ;;  %v25_v42 = vld [vmem:[%s480_s1 + $0x60] sm:$0xff]  ;;  %v26_v43 = vld [vmem:[%s480_s1 + $0x68] sm:$0xff]  ;;  %v43_v44 = vld [vmem:[%s480_s1 + $0xf0] sm:$0xff]  ;;  %278 = vmatprep.mubr.msk.f32.mxu1 %vm344_vm1, %v343_v54  ;;  %v134_v57 = vshrl.u32 %v133_v56, 7 }
   0xf   :  { %v44_v45 = vld [vmem:[%s480_s1 + $0xf8] sm:$0xff]  ;;  %v307_v46 = vpack.c.bf16 %v26_v43, %v25_v42  ;;  %v27_v48 = vld [vmem:[%s480_s1 + $0x70] sm:$0xff]  ;;  %v46_v52 = vld [vmem:[%s480_s1 + $0x108] sm:$0x1] }
  0x10   :  { %v309_v47 = vpack.c.bf16 %v44_v45, %v43_v44  ;;  %v28_v49 = vld [vmem:[%s480_s1 + $0x78] sm:$0xff]  ;;  %v140_v53 = vrot.slane %v46_v52, 1  ;;  %v135_v58 = vsub.s32 0, %v134_v57  ;;  %s346_s1 = smov [#allocation2]  }
  0x11   :  { %296 = vmatpush3.bf16.msra.mxu0 %v295_v28  ;;  %v311_v50 = vpack.c.bf16 %v28_v49, %v27_v48  ;;  %s229_s24 = sshll.u32 %s346_s1, 4  ;;  %s230_s24 = int_to_ptr.vmem [resolvable:$true] %s229_s24 }
  0x12   :  { %298 = vmatprep.subr.bf16.mxu0 %v297_v29  ;;  %v141_v55 = vsel %vm138_vm0, %v139_v51, %v140_v53  ;;  %v136_v59 = vrot.slane %v45_v27, %v135_v58  ;;  %s319_s0 = scalar_lea.vmem %s230_s24, 32  ;;  %p324_p1 = scmp.lt.s32.totalorder %s230_s24, %s230_s24 }
  0x13   :  { %277 = vmatpush3.msra.mxu1 %v141_v55  ;;  %p320_p0 = scmp.ne.s32.totalorder %s230_s24, %s319_s0  ;;  %p325_p2 = scmp.lt.s32.totalorder %s319_s0, %s319_s0 }
  0x14   :  { %144 = vrot.lane.b32.xlu0 %v136_v59, %s345_s22 }
  0x15   :  { %300 = vmatpush3.bf16.msra.mxu0 %v299_v34  ;;  %p326_p3 = por %p325_p2, %p324_p1 }
  0x16   :  { %302 = vmatprep.subr.bf16.mxu0 %v301_v35 }
  0x17   :  { %p327_p4 = pnand %p326_p3, %p320_p0 }
  0x19   :  { %304 = vmatpush3.bf16.msra.mxu0 %v303_v40 }
  0x1a   :  { %306 = vmatprep.subr.bf16.mxu0 %v305_v41 }
  0x1d   :  { %308 = vmatpush3.bf16.msra.mxu0 %v307_v46 }
  0x1e   :  { %310 = vmatprep.subr.bf16.mxu0 %v309_v47 }
  0x21   :  { %312 = vmatpush3.bf16.msra.mxu0 %v311_v50 }
  0x24   :  { %127 = vmatmul.mubr.f32.vlgmr.msra.gmra.mrb[0].mxu0 %v237_v25 }
  0x3c   :  { %s314_s23 = spop %313 }
  0x3d   :  { %v49_v62 = vstv %s314_s23 }
  0x86   :  { %v145_v2 = vpop.permute.xlu0 %144 }
  0xf7   :  { %v271_v60 = vpop.f32.mrb[0].mxu0 }
  0xf8   :  { %v272_v61 = vpop.f32.mrb[1].mxu0 }
  0xf9   :  { %v273_v63 = vadd.f32 %v272_v61, %v271_v60 }
  0xfb   :  { %v129_v0 = vadd.f32 %v273_v63, %v49_v62 }
  0xfd   :  { %v132_v1 = vmax.f32 %v129_v0, 0.0 }
  0xff   :  { %279 = vmatmul.mubr.msk.f32.vlgmr.msra.gmra.mrb[0].mxu1 %vm147_vm2, %v132_v1 }
 0x1d2   :  { %v217_v3 = vpop.f32.mrb[0].mxu1 }
 0x1d3   :  { %v218_v4 = vadd.f32 %v217_v3, %v145_v2  ;;  %v280_v5 = vpop.f32.mrb[1].mxu1 }
 0x1d5   :  { %222 = vst.msk [vmem:[#allocation2] sm:$0x3] %vm221_vm3, %v218_v4 }
 0x1d6   :  { %330 = shalt.err (!%p327_p4)
}
 0x1d7   :  { %s331_s27 = scalar_lea.hbm %s481_s2, 32 }
 0x1d8   :  { %p332_p5 = scmp.ne.s32.totalorder %s481_s2, %s331_s27  ;;  %p335_p6 = scmp.lt.u32.totalorder %s331_s27, %s481_s2 }
 0x1da   :  { %p337_p7 = pnand %p335_p6, %p332_p5 }
 0x1dc   :  { %340 = shalt.err (!%p337_p7)
}
 0x1dd   :  { %232 = dma.vmem_to_hbm [thread:$0]  %s230_s24, 32, %s481_s2, [#allocation3]  }
 0x1de   :  { %341 = dma.done.wait [#allocation3], 32  }
 0x1df   :  { %342 = vsyncadd [#allocation3], 4294967264 }
 0x1e0   :  { %236 = vsyncpa [#allocation3], 1 }

</bundles_post_ra>
